<compile_context>
chip_gen: v5e
topology: v5e:2x2
jax: 0.10.0
libtpu: 0.0.40
codegen_flags: <defaults>
</compile_context>

<pallas_src>
import functools

import jax
import jax.numpy as jnp
from jax.experimental import pallas as pl
from jax.experimental.pallas import tpu as pltpu

LANES = 128
MAX_TILE_ROWS = 2048      # (2048, 128) f32 tile = 1 MiB per pipeline buffer
NUM_CORE_SPLITS = 2       # v7x has 2 TensorCores; extra split is free elsewhere


def _round_up(a, b):
    return (a + b - 1) // b * b


def _dice_kernel(x_ref, y_ref, out_ref, acc_ref, *,
                 tile_rows, total_rows, tiles_per_core, needs_mask):
    """Accumulate per-lane partial sums of x*y and x+y for one tile.

    acc_ref (VMEM, (2, 8, LANES) f32): [0] = intersection, [1] = sum(x)+sum(y)
    out_ref (VMEM, (1, 2, 8, LANES) f32): this core's partials, set once.
    """
    c = pl.program_id(0)
    i = pl.program_id(1)

    @pl.when(i == 0)
    def _():
        acc_ref[...] = jnp.zeros_like(acc_ref)

    x = x_ref[...].astype(jnp.float32)
    y = y_ref[...].astype(jnp.float32)

    if needs_mask:
        # Zero out rows past the end of the ragged / duplicated last tile.
        tile_idx = c * tiles_per_core + i
        row_ids = tile_idx * tile_rows + jax.lax.broadcasted_iota(
            jnp.int32, (tile_rows, LANES), 0)
        valid = row_ids < total_rows
        x = jnp.where(valid, x, 0.0)
        y = jnp.where(valid, y, 0.0)

    # Lane/sublane-parallel partial reduction: (tile_rows, 128) -> (8, 128).
    groups = tile_rows // 8
    acc_ref[0] += (x * y).reshape(groups, 8, LANES).sum(axis=0)
    acc_ref[1] += (x + y).reshape(groups, 8, LANES).sum(axis=0)

    @pl.when(i == pl.num_programs(1) - 1)
    def _():
        out_ref[0] = acc_ref[...]


def dice_loss(inputs, outputs, epsilon):
    """JAX/Pallas equivalent of DiceLoss(epsilon)(inputs, outputs)."""
    x = jnp.ravel(inputs)
    y = jnp.ravel(outputs)
    n = x.shape[0]

    # Handle a sub-lane tail (< 128 elements) with plain jnp so the main
    # array is never padded (which would copy the whole tensor).
    tail = n % LANES
    main_n = n - tail
    if tail:
        xt = x[main_n:].astype(jnp.float32)
        yt = y[main_n:].astype(jnp.float32)
        inter_tail = jnp.sum(xt * yt)
        sxy_tail = jnp.sum(xt) + jnp.sum(yt)
    else:
        inter_tail = jnp.float32(0.0)
        sxy_tail = jnp.float32(0.0)

    if main_n == 0:
        intersection = inter_tail
        sum_xy = sxy_tail
    else:
        rows = main_n // LANES
        tile_rows = min(MAX_TILE_ROWS, _round_up(rows, 16))
        num_tiles = pl.cdiv(rows, tile_rows)
        tiles_per_core = pl.cdiv(num_tiles, NUM_CORE_SPLITS)
        covered_rows = NUM_CORE_SPLITS * tiles_per_core * tile_rows
        needs_mask = covered_rows > rows

        x2d = x[:main_n].reshape(rows, LANES)
        y2d = y[:main_n].reshape(rows, LANES)

        kernel = functools.partial(
            _dice_kernel,
            tile_rows=tile_rows,
            total_rows=rows,
            tiles_per_core=tiles_per_core,
            needs_mask=needs_mask,
        )

        def in_index(c, i):
            # Clamp so a fully out-of-range tile (odd tile count under the
            # 2-way core split) stays in bounds; the in-kernel mask zeroes
            # its contribution regardless of what data gets loaded.
            t = jnp.minimum(c * tiles_per_core + i, num_tiles - 1)
            return (t, 0)

        itemsize = jnp.dtype(x.dtype).itemsize
        cost = pl.CostEstimate(
            flops=3 * main_n,
            transcendentals=0,
            bytes_accessed=2 * main_n * itemsize,
        )

        partials = pl.pallas_call(
            kernel,
            out_shape=jax.ShapeDtypeStruct(
                (NUM_CORE_SPLITS, 2, 8, LANES), jnp.float32),
            grid_spec=pltpu.PrefetchScalarGridSpec(
                num_scalar_prefetch=0,
                grid=(NUM_CORE_SPLITS, tiles_per_core),
                in_specs=[
                    pl.BlockSpec((tile_rows, LANES), in_index),
                    pl.BlockSpec((tile_rows, LANES), in_index),
                ],
                out_specs=pl.BlockSpec(
                    (1, 2, 8, LANES), lambda c, i: (c, 0, 0, 0)),
                scratch_shapes=[pltpu.VMEM((2, 8, LANES), jnp.float32)],
            ),
            compiler_params=pltpu.CompilerParams(
                dimension_semantics=("parallel", "arbitrary"),
            ),
            cost_estimate=cost,
        )(x2d, y2d)

        intersection = jnp.sum(partials[:, 0]) + inter_tail
        sum_xy = jnp.sum(partials[:, 1]) + sxy_tail

    eps = jnp.float32(epsilon)
    dice = (2.0 * intersection + eps) / (sum_xy + eps)
    return jnp.float32(1.0) - dice


def _reference_dice_loss(inputs, outputs, epsilon):
    x = jnp.ravel(inputs).astype(jnp.float32)
    y = jnp.ravel(outputs).astype(jnp.float32)
    intersection = jnp.sum(x * y)
    dice = (2.0 * intersection + epsilon) / (jnp.sum(x) + jnp.sum(y) + epsilon)
    return 1.0 - dice


if __name__ == "__main__":
    epsilon = 1.0

    key = jax.random.PRNGKey(0)
    k1, k2 = jax.random.split(key)
    # Small NCHW-like shapes consistent with a segmentation-style use of DiceLoss.
    inputs = jax.nn.sigmoid(jax.random.normal(k1, (2, 4, 16, 16), dtype=jnp.float32))
    outputs = (jax.random.uniform(k2, (2, 4, 16, 16)) > 0.5).astype(jnp.float32)

    loss = dice_loss(inputs, outputs, epsilon)
    jax.block_until_ready(loss)

    ref = _reference_dice_loss(inputs, outputs, epsilon)
    assert jnp.allclose(loss, ref, atol=1e-5, rtol=1e-5), (loss, ref)

    print("KERNEL_OK")
</pallas_src>

<mosaic_0001>
module attributes {stable_mosaic.version = 11 : i64} {
  func.func @_dice_kernel(%arg0: i32, %arg1: i32, %arg2: memref<16x128xf32, #tpu.memory_space<vmem>>, %arg3: memref<16x128xf32, #tpu.memory_space<vmem>>, %arg4: memref<1x2x8x128xf32, #tpu.memory_space<vmem>>, %arg5: memref<2x8x128xf32, #tpu.memory_space<vmem>>) attributes {dimension_semantics = [#tpu.dimension_semantics<parallel>, #tpu.dimension_semantics<arbitrary>], iteration_bounds = array<i64: 2, 1>, scalar_prefetch = 0 : i64, scratch_operands = 1 : i64, tpu.core_type = #tpu.core_type<tc>, window_params = [{transform_indices = @transform_0, window_bounds = array<i64: 16, 128>}, {transform_indices = @transform_1, window_bounds = array<i64: 16, 128>}, {transform_indices = @transform_2, window_bounds = array<i64: 1, 2, 8, 128>}]} {
    %c0_i32 = arith.constant 0 : i32
    %0 = arith.cmpi eq, %arg1, %c0_i32 : i32
    %1 = arith.extui %0 : i1 to i32
    %c0_i32_0 = arith.constant 0 : i32
    %2 = arith.cmpi ne, %1, %c0_i32_0 : i32
    scf.if %2 {
      %cst_21 = arith.constant 0.000000e+00 : f32
      %38 = vector.broadcast %cst_21 : f32 to vector<2x8x128xf32>
      %c0_22 = arith.constant 0 : index
      %c0_23 = arith.constant 0 : index
      %c0_24 = arith.constant 0 : index
      %39 = vector.load %arg5[%c0_22, %c0_23, %c0_24] : memref<2x8x128xf32, #tpu.memory_space<vmem>>, vector<2x8x128xf32>
      tpu.vector_store %arg5[%c0_22, %c0_23, %c0_24], %38 {strides = array<i32>} : memref<2x8x128xf32, #tpu.memory_space<vmem>>, vector<2x8x128xf32>,
    } else {
    }
    %c0 = arith.constant 0 : index
    %c0_1 = arith.constant 0 : index
    %3 = vector.load %arg2[%c0, %c0_1] : memref<16x128xf32, #tpu.memory_space<vmem>>, vector<16x128xf32>
    %c0_2 = arith.constant 0 : index
    %c0_3 = arith.constant 0 : index
    %4 = vector.load %arg3[%c0_2, %c0_3] : memref<16x128xf32, #tpu.memory_space<vmem>>, vector<16x128xf32>
    %c1_i32 = arith.constant 1 : i32
    %5 = arith.muli %arg0, %c1_i32 : i32
    %6 = arith.addi %5, %arg1 : i32
    %c16_i32 = arith.constant 16 : i32
    %7 = arith.muli %6, %c16_i32 : i32
    %8 = tpu.iota {dimensions = array<i32: 0>} : vector<16x128xi32>
    %9 = vector.broadcast %7 : i32 to vector<16x128xi32>
    %10 = arith.addi %9, %8 : vector<16x128xi32>
    %c16_i32_4 = arith.constant 16 : i32
    %11 = vector.broadcast %c16_i32_4 : i32 to vector<16x128xi32>
    %12 = arith.cmpi slt, %10, %11 : vector<16x128xi32>
    %cst = arith.constant 0.000000e+00 : f32
    %13 = vector.broadcast %cst : f32 to vector<16x128xf32>
    %14 = arith.select %12, %3, %13 : vector<16x128xi1>, vector<16x128xf32>
    %cst_5 = arith.constant 0.000000e+00 : f32
    %15 = vector.broadcast %cst_5 : f32 to vector<16x128xf32>
    %16 = arith.select %12, %4, %15 : vector<16x128xi1>, vector<16x128xf32>
    %c0_6 = arith.constant 0 : index
    %c0_7 = arith.constant 0 : index
    %c0_8 = arith.constant 0 : index
    %17 = vector.load %arg5[%c0_6, %c0_7, %c0_8] : memref<2x8x128xf32, #tpu.memory_space<vmem>>, vector<1x8x128xf32>
    %18 = vector.shape_cast %17 : vector<1x8x128xf32> to vector<8x128xf32>
    %19 = arith.mulf %14, %16 : vector<16x128xf32>
    %20 = vector.shape_cast %19 : vector<16x128xf32> to vector<2x8x128xf32>
    %cst_9 = arith.constant dense<0.000000e+00> : vector<8x128xf32>
    %21 = vector.multi_reduction <add>, %20, %cst_9 [0] : vector<2x8x128xf32> to vector<8x128xf32>
    %22 = arith.addf %18, %21 : vector<8x128xf32>
    %c0_10 = arith.constant 0 : index
    %c0_11 = arith.constant 0 : index
    %c0_12 = arith.constant 0 : index
    %23 = vector.load %arg5[%c0_10, %c0_11, %c0_12] : memref<2x8x128xf32, #tpu.memory_space<vmem>>, vector<1x8x128xf32>
    %24 = vector.shape_cast %23 : vector<1x8x128xf32> to vector<8x128xf32>
    %25 = vector.shape_cast %22 : vector<8x128xf32> to vector<1x8x128xf32>
    tpu.vector_store %arg5[%c0_10, %c0_11, %c0_12], %25 {strides = array<i32>} : memref<2x8x128xf32, #tpu.memory_space<vmem>>, vector<1x8x128xf32>,
    %c1 = arith.constant 1 : index
    %c0_13 = arith.constant 0 : index
    %c0_14 = arith.constant 0 : index
    %26 = vector.load %arg5[%c1, %c0_13, %c0_14] : memref<2x8x128xf32, #tpu.memory_space<vmem>>, vector<1x8x128xf32>
    %27 = vector.shape_cast %26 : vector<1x8x128xf32> to vector<8x128xf32>
    %28 = arith.addf %14, %16 : vector<16x128xf32>
    %29 = vector.shape_cast %28 : vector<16x128xf32> to vector<2x8x128xf32>
    %cst_15 = arith.constant dense<0.000000e+00> : vector<8x128xf32>
    %30 = vector.multi_reduction <add>, %29, %cst_15 [0] : vector<2x8x128xf32> to vector<8x128xf32>
    %31 = arith.addf %27, %30 : vector<8x128xf32>
    %c1_16 = arith.constant 1 : index
    %c0_17 = arith.constant 0 : index
    %c0_18 = arith.constant 0 : index
    %32 = vector.load %arg5[%c1_16, %c0_17, %c0_18] : memref<2x8x128xf32, #tpu.memory_space<vmem>>, vector<1x8x128xf32>
    %33 = vector.shape_cast %32 : vector<1x8x128xf32> to vector<8x128xf32>
    %34 = vector.shape_cast %31 : vector<8x128xf32> to vector<1x8x128xf32>
    tpu.vector_store %arg5[%c1_16, %c0_17, %c0_18], %34 {strides = array<i32>} : memref<2x8x128xf32, #tpu.memory_space<vmem>>, vector<1x8x128xf32>,
    %c0_i32_19 = arith.constant 0 : i32
    %35 = arith.cmpi eq, %arg1, %c0_i32_19 : i32
    %36 = arith.extui %35 : i1 to i32
    %c0_i32_20 = arith.constant 0 : i32
    %37 = arith.cmpi ne, %36, %c0_i32_20 : i32
    scf.if %37 {
      %c0_21 = arith.constant 0 : index
      %c0_22 = arith.constant 0 : index
      %c0_23 = arith.constant 0 : index
      %38 = vector.load %arg5[%c0_21, %c0_22, %c0_23] : memref<2x8x128xf32, #tpu.memory_space<vmem>>, vector<2x8x128xf32>
      %c0_24 = arith.constant 0 : index
      %c0_25 = arith.constant 0 : index
      %c0_26 = arith.constant 0 : index
      %c0_27 = arith.constant 0 : index
      %39 = vector.load %arg4[%c0_24, %c0_25, %c0_26, %c0_27] : memref<1x2x8x128xf32, #tpu.memory_space<vmem>>, vector<1x2x8x128xf32>
      %40 = vector.shape_cast %39 : vector<1x2x8x128xf32> to vector<2x8x128xf32>
      %41 = vector.shape_cast %38 : vector<2x8x128xf32> to vector<1x2x8x128xf32>
      tpu.vector_store %arg4[%c0_24, %c0_25, %c0_26, %c0_27], %41 {strides = array<i32>} : memref<1x2x8x128xf32, #tpu.memory_space<vmem>>, vector<1x2x8x128xf32>,
    } else {
    }
    return
  }
  func.func @transform_0(%arg0: i32, %arg1: i32) -> (i32, i32) {
    %c1_i32 = arith.constant 1 : i32
    %0 = arith.muli %arg0, %c1_i32 : i32
    %1 = arith.addi %0, %arg1 : i32
    %c0_i32 = arith.constant 0 : i32
    %2 = arith.minsi %1, %c0_i32 : i32
    %c0_i32_0 = arith.constant 0 : i32
    %c0_i32_1 = arith.constant 0 : i32
    return %2, %c0_i32_0 : i32, i32
  }
  func.func @transform_1(%arg0: i32, %arg1: i32) -> (i32, i32) {
    %c1_i32 = arith.constant 1 : i32
    %0 = arith.muli %arg0, %c1_i32 : i32
    %1 = arith.addi %0, %arg1 : i32
    %c0_i32 = arith.constant 0 : i32
    %2 = arith.minsi %1, %c0_i32 : i32
    %c0_i32_0 = arith.constant 0 : i32
    %c0_i32_1 = arith.constant 0 : i32
    return %2, %c0_i32_0 : i32, i32
  }
  func.func @transform_2(%arg0: i32, %arg1: i32) -> (i32, i32, i32, i32) {
    %c0_i32 = arith.constant 0 : i32
    %c0_i32_0 = arith.constant 0 : i32
    %c0_i32_1 = arith.constant 0 : i32
    %c0_i32_2 = arith.constant 0 : i32
    return %arg0, %c0_i32, %c0_i32_0, %c0_i32_1 : i32, i32, i32, i32
  }
}

</mosaic_0001>

<bundles_post_ra>
// kernel: tpu_custom_call.1
= control target key start
LH: loop header
LB: loop body
LE: loop exit
PB: predicated region body
PF: predicated region fallthrough
CT: control target
= control target key end

     0   :  { %7 = vsyncpa [#allocation4], 0  ;;  %s888_s0 = inlined_call_operand.hbm [shape: f32[16,128], index: 0, kind: input, shape index: {}]   ;;  %s889_s1 = inlined_call_operand.hbm [shape: f32[16,128], index: 1, kind: input, shape index: {}]   ;;  %s890_s2 = inlined_call_operand.hbm [shape: f32[2,2,8,128], index: 2, kind: output, shape index: {}]  }
   0x1   :  { %9 = vsyncpa [#allocation4 + $0x1], 0 }
   0x2   :  { %10 = vsyncpa [#allocation7], 0 }
   0x3   :  { %12 = vsyncpa [#allocation7 + $0x1], 0 }
   0x4   :  { %13 = vsyncpa [#allocation5], 0 }
   0x5   :  { %15 = vsyncpa [#allocation5 + $0x1], 0  ;;  %s716_s9 = smov 0   ;;  %s718_s10 = smov 0  }
   0x6   :  { %s720_s11 = smov 0   ;;  %s722_s12 = smov 0  }
   0x7   :  { %s724_s13 = smov 0   ;;  %s726_s14 = smov 0  }
   0x8   :  { %s728_s15 = smov 0   ;;  %s730_s16 = smov 0  }
   0x9 LB: > { %s408_s17 = sadd.s32 4294967295, %s693_s16   ;;  %s409_s18 = sadd.s32 4294967294, %s693_s16   ;;  %s693_s16 = sphi %s730_s16, %s21_s16   ;;  %s689_s15 = sphi %s728_s15, %s902_s15   ;;  %s685_s14 = sphi %s726_s14, %s901_s14   ;;  %s681_s13 = sphi %s724_s13, %s878_s13   ;;  %s677_s12 = sphi %s722_s12, %s900_s12   ;;  %s673_s11 = sphi %s720_s11, %s899_s11   ;;  %s669_s10 = sphi %s718_s10, %s898_s10   ;;  %s665_s9 = sphi %s716_s9, %s897_s9  }
   0xa   : > { %s33_s19 = sadd.s32 1, %s689_s15  ;;  %p662_p1 = scmp.ne.s32.totalorder %s681_s13, 0 }
   0xb   : > { %p35_p0 = scmp.ge.s32.totalorder %s33_s19, 2  ;;  %p54_p2 = scmp.eq.s32.totalorder %s693_s16, 0 }
   0xc   : > { %p59_p3 = scmp.ne.s32.totalorder %s681_s13, %s677_s12  ;;  %p60_p5 = scmp.eq.s32.totalorder %s408_s17, 0 }
   0xd   : > { %s904_s19 = smov (%p35_p0, %s33_s19), 0  ;;  %p762_p4 = por %p662_p1, %p54_p2 }
   0xe   : > { %p766_p6 = por %p60_p5, %p59_p3  ;;  %s101_s22 = ssub.s32 %s689_s15, %s904_s19 }
   0xf   : > { %p102_p7 = scmp.eq.s32.totalorder %s101_s22, 0  ;;  %s104_s23 = sadd.s32 1, %s673_s11 }
  0x10   : > { %p114_p8 = scmp.ne.s32.totalorder %s673_s11, %s669_s10  ;;  %p115_p9 = scmp.eq.s32.totalorder %s408_s17, 1 }
  0x11   : > { %s774_s24 = scalar_select %p102_p7, %s673_s11, %s104_s23  }
  0x12   : > { %p120_p10 = scmp.ne.s32.totalorder %s669_s10, %s665_s9  ;;  %p121_p11 = scmp.eq.s32.totalorder %s409_s18, 1 }
  0x13   : > { %p780_p12 = por %p115_p9, %p114_p8  ;;  %p411_p13 = scmp.ge.s32.totalorder %s693_s16, 2 }
  0x14   : > { %p785_p0 = por %p121_p11, %p120_p10  ;;  %p448_p1 = scmp.lt.s32.totalorder %s693_s16, 2 }
  0x15   : > { %s154_s29 = sshll.u32 %s888_s0, 4  ;;  %s695_s30 = smov [#allocation3]   ;;  %s155_s29 = int_to_ptr.hbm [resolvable:$true] %s154_s29 }
  0x16   : > { %s156_s3 = sshll.u32 %s695_s30, 4  ;;  %p795_p2 = pnand %p448_p1, %p762_p4  ;;  %s157_s3 = int_to_ptr.vmem [resolvable:$true] %s156_s3 }
  0x17   : > { %p418_p3 = scmp.ge.s32.totalorder %s693_s16, 1  ;;  %p189_p5 = scmp.lt.s32.totalorder %s693_s16, 3 }
  0x18   : > { %s526_s5 = sshra.s32 %s155_s29, 4  ;;  %p530_p8 = pneg %p795_p2  ;;  %s527_s5 = int_to_ptr.hbm [resolvable:$true] %s526_s5 }
  0x19   : > { %s528_s6 = scalar_lea.hbm %s527_s5, 16  ;;  %s533_s12 = scalar_lea.hbm %s888_s0, 16 }
  0x1a   : > { %p529_p7 = scmp.ne.s32.totalorder %s527_s5, %s528_s6  ;;  %p535_p4 = scmp.lt.s32.totalorder %s533_s12, %s528_s6 }
  0x1c   : > { %p531_p9 = pnand %p530_p8, %p529_p7 }
  0x1e   : > { %p532_p10 = pneg %p531_p9 }
  0x20   : > { %p537_p11 = pnand %p535_p4, %p532_p10 }
  0x22   : > { %540 = shalt.err (!%p537_p11)
}
  0x23   : > { %s696_s17 = smov 128   ;;  %s697_s18 = smov 8  }
  0x24   : > { %440 = dma.hbm_to_vmem [thread:$0]  (!%p795_p2), %s155_s29, 256, %s157_s3, [#allocation4], %s696_s17, %s696_s17, %s697_s18  }
  0x25   : > { %p815_p1 = pnand %p418_p3, %p189_p5  ;;  %s179_s27 = sshll.u32 %s889_s1, 4  ;;  %s180_s27 = int_to_ptr.hbm [resolvable:$true] %s179_s27 }
  0x26   : > { %s698_s28 = smov [#allocation6]   ;;  %s556_s5 = sshra.s32 %s180_s27, 4  ;;  %s557_s5 = int_to_ptr.hbm [resolvable:$true] %s556_s5 }
  0x27   : > { %s181_s30 = sshll.u32 %s698_s28, 4  ;;  %s558_s6 = scalar_lea.hbm %s557_s5, 16  ;;  %s182_s30 = int_to_ptr.vmem [resolvable:$true] %s181_s30 }
  0x28   : > { %p559_p7 = scmp.ne.s32.totalorder %s557_s5, %s558_s6  ;;  %s563_s7 = scalar_lea.hbm %s889_s1, 16 }
  0x29   : > { %p565_p3 = scmp.lt.s32.totalorder %s563_s7, %s558_s6 }
  0x2a   : > { %p561_p9 = pnand %p559_p7, %p530_p8 }
  0x2c   : > { %p562_p10 = pneg %p561_p9 }
  0x2e   : > { %p567_p5 = pnand %p565_p3, %p562_p10 }
  0x30   : > { %570 = shalt.err (!%p567_p5)
}
  0x31   : > { %443 = dma.hbm_to_vmem [thread:$0]  (!%p795_p2), %s180_s27, 256, %s182_s30, [#allocation7], %s696_s17, %s696_s17, %s697_s18  }
  0x32   : > { %193 = sbr.rel (%p815_p1) target bundleno = 77 (0x4d), region = 28  ;;  %s195_s8 = sand.u32 (!%p815_p1), 1, %s681_s13  }
  0x33   : > { %s419_s12 = sshll.u32 (!%p815_p1), %s195_s8, 4  ;;  %s196_s22 = scalar_lea.sflag (!%p815_p1), [#allocation4], %s195_s8 }
  0x34   : > { %s199_s23 = scalar_lea.vmem (!%p815_p1), [#allocation3], %s419_s12 }
  0x37   : > { %651 = dma.done.wait (%p766_p6), %s196_s22, 256  }
  0x38   : > { %653 = vsyncadd (%p766_p6), %s196_s22, 4294967040  ;;  %s206_s28 = scalar_lea.sflag [#allocation7], %s195_s8  ;;  %s209_s5 = scalar_lea.vmem [#allocation6], %s419_s12 }
  0x39   : > { %655 = dma.done.wait (%p766_p6), %s206_s28, 256  }
  0x3a   : > { %657 = vsyncadd (%p766_p6), %s206_s28, 4294967040  ;;  %s233_s4 = sand.u32 1, %s669_s10   ;;  %s422_s17 = sshll.u32 %s685_s14, 4  ;;  %v256_v0 = vlaneseq  ;;  %v250_v6 = vld [vmem:[%s199_s23] sm:$0xff]  ;;  %v251_v7 = vld [vmem:[%s199_s23 + $0x8] sm:$0xff] }
  0x3b   : > { %v259_v1 = vstv %s422_s17  ;;  %s421_s18 = sshll.u32 %s233_s4, 4  ;;  %s300_s30 = scalar_lea.hbm %s890_s2, %s422_s17  ;;  %v252_v8 = vld [vmem:[%s209_s5] sm:$0xff]  ;;  %v253_v9 = vld [vmem:[%s209_s5 + $0x8] sm:$0xff] }
  0x3c   : > { %v257_v2 = vshrl.u32 %v256_v0, 7  ;;  %s235_s14 = scalar_lea.vmem [#allocation8], %s421_s18  ;;  %s303_s6 = sshll.u32 %s300_s30, 4  ;;  %s304_s6 = int_to_ptr.hbm [resolvable:$true] %s303_s6 }
  0x3d   : > { %s301_s21 = sshll.u32 %s235_s14, 4  ;;  %s289_s29 = scalar_lea.sflag [#allocation5], %s233_s4  ;;  %s302_s21 = int_to_ptr.vmem [resolvable:$true] %s301_s21 }
  0x3e   : > { %v258_v3 = vadd.s32 8, %v257_v2  ;;  %v260_v4 = vadd.s32 %v259_v1, %v257_v2  ;;  %s600_s3 = sshra.s32 %s304_s6, 4  ;;  %s606_s22 = scalar_lea.hbm %s890_s2, 32  ;;  %s601_s3 = int_to_ptr.hbm [resolvable:$true] %s600_s3 }
  0x3f   : > { %s602_s7 = scalar_lea.hbm %s601_s3, 16  ;;  %p607_p4 = scmp.lt.s32.totalorder %s601_s3, %s890_s2 }
  0x40   : > { %v261_v5 = vadd.s32 %v259_v1, %v258_v3  ;;  %vm262_vm0 = vcmp.lt.s32.totalorder %v260_v4, 16  ;;  %p603_p6 = scmp.ne.s32.totalorder %s601_s3, %s602_s7  ;;  %p608_p11 = scmp.lt.s32.totalorder %s606_s22, %s602_s7 }
  0x41   : > { %v264_v10 = vsel %vm262_vm0, %v250_v6, 0.0  ;;  %v266_v11 = vsel %vm262_vm0, %v252_v8, 0.0 }
  0x42   : > { %vm263_vm1 = vcmp.lt.s32.totalorder %v261_v5, 16  ;;  %v269_v14 = vmul.f32 %v266_v11, %v264_v10  ;;  %v276_v15 = vadd.f32 %v266_v11, %v264_v10  ;;  %p604_p2 = pnand %p603_p6, %p780_p12  ;;  %p609_p1 = por %p608_p11, %p607_p4 }
  0x43   : > { %v265_v12 = vsel %vm263_vm1, %v251_v7, 0.0  ;;  %v267_v13 = vsel %vm263_vm1, %v253_v9, 0.0 }
  0x44   : > { %v270_v16 = vmul.f32 %v267_v13, %v265_v12  ;;  %v277_v17 = vadd.f32 %v267_v13, %v265_v12  ;;  %p605_p8 = pneg %p604_p2 }
  0x46   : > { %v271_v18 = vadd.f32 %v270_v16, %v269_v14  ;;  %v278_v19 = vadd.f32 %v277_v17, %v276_v15  ;;  %p610_p7 = pnand %p609_p1, %p605_p8 }
  0x48   : > { %286 = vst [vmem:[%s235_s14] sm:$0xff] %v271_v18 }
  0x49   : > { %287 = vst [vmem:[%s235_s14 + $0x8] sm:$0xff] %v278_v19 }
  0x4a   : > { %613 = shalt.err (!%p610_p7)
}
  0x4b   : > { %s699_s5 = smov 128   ;;  %s700_s4 = smov 8  }
  0x4c   : > { %435 = dma.vmem_to_hbm [thread:$0]  (%p780_p12), %s302_s21, 256, %s304_s6, %s289_s29, %s699_s5, %s699_s5, %s700_s4  }
  0x4d PF: > { %s318_s17 = sand.u32 1, %s665_s9   ;;  %p445_p9 = pnand %p411_p13, %p785_p0 }
  0x4e   : > { %s319_s18 = scalar_lea.sflag [#allocation5], %s318_s17 }
  0x4f   : > { %p446_p10 = pneg %p445_p9 }
  0x51   : > { %659 = dma.done.wait (%p446_p10), %s319_s18, 256  }
  0x52   : > { %661 = vsyncadd (%p446_p10), %s319_s18, 4294967040  ;;  %s21_s16 = sadd.s32 1, %s693_s16   ;;  %s897_s9 = smov %s669_s10 }
  0x53   : > { %p18_p3 = scmp.ge.s32.totalorder %s21_s16, 4   ;;  %s898_s10 = smov %s673_s11 }
  0x54   : > { %s899_s11 = smov %s774_s24  ;;  %s900_s12 = smov %s681_s13 }
  0x55   : > { %s878_s13 = smov 0   ;;  %s901_s14 = smov %s689_s15 }
  0x56   : > { %s902_s15 = smov %s904_s19  ;;  %20 = sbr.rel (!%p18_p3) target bundleno = 9 (0x9), region = 95 }
  0x5b   :  { %325 = vsyncpa [#allocation4], 1 }
  0x5c   :  { %327 = vsyncpa [#allocation4 + $0x1], 1 }
  0x5d   :  { %328 = vsyncpa [#allocation7], 1 }
  0x5e   :  { %330 = vsyncpa [#allocation7 + $0x1], 1 }
  0x5f   :  { %331 = vsyncpa [#allocation5], 1 }
  0x60   :  { %333 = vsyncpa [#allocation5 + $0x1], 1 }

</bundles_post_ra>
